<compile_context>
chip_gen: v7x
topology: tpu7x:2x2x1
jax: 0.10.0
libtpu: 0.0.40
codegen_flags: <defaults>
</compile_context>

<pallas_src>
import math

import jax
import jax.numpy as jnp
from jax.experimental import pallas as pl
from jax.experimental.pallas import tpu as pltpu


def _layerscale_kernel(x_ref, g_ref, o_ref):
    # (TN, L) tile * (1, L) gamma row: plain VPU broadcast multiply.
    o_ref[...] = x_ref[...] * g_ref[...]


def layer_scale(x: jax.Array, gamma: jax.Array) -> jax.Array:
    """Applies y = x * gamma with gamma broadcast over the last axis of x."""
    orig_shape = x.shape
    D = orig_shape[-1]
    assert gamma.shape == (D,), f"gamma must be ({D},), got {gamma.shape}"

    total = math.prod(orig_shape)
    itemsize = jnp.dtype(x.dtype).itemsize

    # Lane-dense layout: fold rows so the last dim is a multiple of 128 when
    # the total element count allows it; otherwise keep D (a block dim equal
    # to the full array dim is always legal).
    L = (D // math.gcd(D, 128)) * 128  # lcm(D, 128)
    if total % L == 0:
        reps = L // D
    else:
        L, reps = D, 1
    g_row = jnp.tile(gamma, reps).astype(x.dtype).reshape(1, L)

    R = total // L
    x2 = x.reshape(R, L)

    # Row-tile size: biggest tile (~8 MiB per buffer) whose double-buffered
    # in+out working set fits comfortably in scoped VMEM on all chips.
    sublane = max(8, 32 // itemsize)                 # 8 f32, 16 bf16, 32 int8
    target_tile_bytes = 8 * 1024 * 1024
    tn = max(1, target_tile_bytes // (L * itemsize))
    tn = max(sublane, (tn // sublane) * sublane)     # aligned row count
    tn = min(tn, R)                                  # TN == R (full dim) is legal

    grid = (pl.cdiv(R, tn),)

    tile_bytes = tn * L * itemsize
    # 2x input + 2x output buffers + gamma + headroom.
    vmem_limit = 4 * tile_bytes + 2 * L * itemsize + (4 << 20)
    vmem_limit = max(vmem_limit, 16 << 20)

    out2 = pl.pallas_call(
        _layerscale_kernel,
        out_shape=jax.ShapeDtypeStruct((R, L), x.dtype),
        grid_spec=pltpu.PrefetchScalarGridSpec(
            num_scalar_prefetch=0,
            grid=grid,
            in_specs=[
                pl.BlockSpec((tn, L), lambda i: (i, 0)),
                pl.BlockSpec((1, L), lambda i: (0, 0)),  # gamma stays resident
            ],
            out_specs=pl.BlockSpec((tn, L), lambda i: (i, 0)),
        ),
        compiler_params=pltpu.CompilerParams(
            dimension_semantics=("parallel",),
            vmem_limit_bytes=int(vmem_limit),
        ),
    )(x2, g_row)

    return out2.reshape(orig_shape)


if __name__ == "__main__":
    key = jax.random.PRNGKey(0)
    B, N, D = 2, 8, 32
    x = jax.random.normal(key, (B, N, D), dtype=jnp.float32)

    # Deterministic parameter init, matching nn.Parameter(init_values * ones(dim)).
    init_values = 1e-05
    gamma = init_values * jnp.ones((D,), dtype=jnp.float32)

    # TODO(synk): inplace=True (x.mul_) has no JAX equivalent without a donated
    # buffer + input_output_aliases; out-of-place path implemented here.
    y = layer_scale(x, gamma)
    y = jax.block_until_ready(y)

    # Reference check against plain JAX broadcast multiply.
    y_ref = x * gamma
    assert y.shape == y_ref.shape
    assert jnp.allclose(y, y_ref, atol=1e-6, rtol=1e-6), "mismatch vs reference"

    print("KERNEL_OK")
</pallas_src>

<mosaic_0001>
module attributes {stable_mosaic.version = 11 : i64} {
  func.func @_layerscale_kernel(%arg0: i32, %arg1: memref<4x128xf32, #tpu.memory_space<vmem>>, %arg2: memref<1x128xf32, #tpu.memory_space<vmem>>, %arg3: memref<4x128xf32, #tpu.memory_space<vmem>>) attributes {dimension_semantics = [#tpu.dimension_semantics<parallel>], iteration_bounds = array<i64: 1>, scalar_prefetch = 0 : i64, scratch_operands = 0 : i64, tpu.core_type = #tpu.core_type<tc>, window_params = [{transform_indices = @transform_0, window_bounds = array<i64: 4, 128>}, {pipeline_mode = #tpu.pipeline_mode<synchronous>, transform_indices = @transform_1, window_bounds = array<i64: 1, 128>}, {transform_indices = @transform_2, window_bounds = array<i64: 4, 128>}]} {
    %c0 = arith.constant 0 : index
    %c0_0 = arith.constant 0 : index
    %0 = vector.load %arg1[%c0, %c0_0] : memref<4x128xf32, #tpu.memory_space<vmem>>, vector<4x128xf32>
    %c0_1 = arith.constant 0 : index
    %c0_2 = arith.constant 0 : index
    %1 = vector.load %arg2[%c0_1, %c0_2] : memref<1x128xf32, #tpu.memory_space<vmem>>, vector<1x128xf32>
    %2 = vector.broadcast %1 : vector<1x128xf32> to vector<4x128xf32>
    %3 = arith.mulf %0, %2 : vector<4x128xf32>
    %c0_3 = arith.constant 0 : index
    %c0_4 = arith.constant 0 : index
    %4 = vector.load %arg3[%c0_3, %c0_4] : memref<4x128xf32, #tpu.memory_space<vmem>>, vector<4x128xf32>
    tpu.vector_store %arg3[%c0_3, %c0_4], %3 {strides = array<i32>} : memref<4x128xf32, #tpu.memory_space<vmem>>, vector<4x128xf32>,
    return
  }
  func.func @transform_0(%arg0: i32) -> (i32, i32) {
    %c0_i32 = arith.constant 0 : i32
    %c0_i32_0 = arith.constant 0 : i32
    return %arg0, %c0_i32 : i32, i32
  }
  func.func @transform_1(%arg0: i32) -> (i32, i32) {
    %c0_i32 = arith.constant 0 : i32
    %c0_i32_0 = arith.constant 0 : i32
    %c0_i32_1 = arith.constant 0 : i32
    return %c0_i32, %c0_i32_0 : i32, i32
  }
  func.func @transform_2(%arg0: i32) -> (i32, i32) {
    %c0_i32 = arith.constant 0 : i32
    %c0_i32_0 = arith.constant 0 : i32
    return %arg0, %c0_i32 : i32, i32
  }
}

</mosaic_0001>

<bundles_post_ra>
// kernel: tpu_custom_call.1
= control target key start
LH: loop header
LB: loop body
LE: loop exit
PB: predicated region body
PF: predicated region fallthrough
CT: control target
= control target key end

     0   :  { %7 = vsyncpa [#allocation3], 0  ;;  %s144_s0 = inlined_call_operand.hbm [shape: f32[4,128], index: 0, kind: input, shape index: {}]   ;;  %s145_s1 = inlined_call_operand.vmem [shape: f32[1,128], index: 1, kind: input, shape index: {}]   ;;  %s146_s2 = inlined_call_operand.hbm [shape: f32[4,128], index: 2, kind: output, shape index: {}]  }
   0x1   :  { %8 = vsyncpa [#allocation4], 0  ;;  %s100_s9 = smov [#allocation2]   ;;  %s52_s13 = scalar_lea.hbm %s144_s0, 64 }
   0x2   :  { %s15_s10 = sshll.u32 %s100_s9, 4  ;;  %p53_p0 = scmp.ne.s32.totalorder %s144_s0, %s52_s13  ;;  %s16_s10 = int_to_ptr.vmem [resolvable:$true] %s15_s10 }
   0x3   :  { %p56_p1 = scmp.lt.u32.totalorder %s52_s13, %s144_s0 }
   0x5   :  { %p58_p2 = pnand %p56_p1, %p53_p0 }
   0x7   :  { %61 = shalt.err (!%p58_p2)
}
   0x8   :  { %s62_s18 = scalar_lea.vmem %s16_s10, 64  ;;  %p67_p4 = scmp.lt.s32.totalorder %s16_s10, %s16_s10 }
   0x9   :  { %p63_p3 = scmp.ne.s32.totalorder %s16_s10, %s62_s18  ;;  %p68_p5 = scmp.lt.s32.totalorder %s62_s18, %s62_s18 }
   0xb   :  { %p69_p6 = por %p68_p5, %p67_p4 }
   0xd   :  { %p70_p7 = pnand %p69_p6, %p63_p3 }
   0xf   :  { %73 = shalt.err (!%p70_p7)
}
  0x10   :  { %18 = dma.hbm_to_vmem [thread:$0]  %s144_s0, 64, %s16_s10, [#allocation3]  }
  0x11   :  { %96 = dma.done.wait [#allocation3], 64  }
  0x12   :  { %97 = vsyncadd [#allocation3], 4294967232  ;;  %s101_s21 = smov [#allocation5]   ;;  %v24_v0 = vld [vmem:[#allocation2] sm:$0xf] }
  0x13   :  { %s40_s22 = sshll.u32 %s101_s21, 4  ;;  %v49_v1 = vld [vmem:[%s145_s1] ss:$0 sm:$0xff]  ;;  %s41_s22 = int_to_ptr.vmem [resolvable:$true] %s40_s22 }
  0x14   :  { %v32_v2 = vmul.f32 %v49_v1, %v24_v0  ;;  %s74_s25 = scalar_lea.vmem %s41_s22, 64  ;;  %p79_p9 = scmp.lt.s32.totalorder %s41_s22, %s41_s22 }
  0x15   :  { %p75_p8 = scmp.ne.s32.totalorder %s41_s22, %s74_s25  ;;  %p80_p10 = scmp.lt.s32.totalorder %s74_s25, %s74_s25 }
  0x16   :  { %33 = vst [vmem:[#allocation5] sm:$0xf] %v32_v2 }
  0x17   :  { %p81_p11 = por %p80_p10, %p79_p9 }
  0x19   :  { %p82_p12 = pnand %p81_p11, %p75_p8 }
  0x1b   :  { %85 = shalt.err (!%p82_p12)
}
  0x1c   :  { %s86_s27 = scalar_lea.hbm %s146_s2, 64 }
  0x1d   :  { %p87_p13 = scmp.ne.s32.totalorder %s146_s2, %s86_s27  ;;  %p90_p0 = scmp.lt.u32.totalorder %s86_s27, %s146_s2 }
  0x1f   :  { %p92_p1 = pnand %p90_p0, %p87_p13 }
  0x21   :  { %95 = shalt.err (!%p92_p1)
}
  0x22   :  { %43 = dma.vmem_to_hbm [thread:$0]  %s41_s22, 64, %s146_s2, [#allocation4]  }
  0x23   :  { %98 = dma.done.wait [#allocation4], 64  }
  0x24   :  { %99 = vsyncadd [#allocation4], 4294967232 }
  0x25   :  { %47 = vsyncpa [#allocation3], 1 }
  0x26   :  { %48 = vsyncpa [#allocation4], 1 }

</bundles_post_ra>
